<compile_context>
chip_gen: v7x
topology: tpu7x:2x2x1
jax: 0.10.0
libtpu: 0.0.40
codegen_flags: <defaults>
</compile_context>

<pallas_src>
import math

import jax
import jax.numpy as jnp
from jax.experimental import pallas as pl
from jax.experimental.pallas import tpu as pltpu

_LANES = 128                                 # vreg lane width
_TILE_BYTES_PER_OPERAND = 2 * 1024 * 1024    # 2 MiB/operand: ~86% HBM roofline,
                                             # 12 MiB total double-buffered (fits v5e).
_MIN_PALLAS_BYTES = 1 * 1024 * 1024          # below this, plain JAX add wins.


def _elesum_kernel(a_ref, b_ref, o_ref):
    # One VPU add over the whole lane-dense VMEM tile.
    o_ref[...] = a_ref[...] + b_ref[...]


def _round_up(x: int, m: int) -> int:
    return ((x + m - 1) // m) * m


def _sublane_multiple(itemsize: int) -> int:
    # Packed dtypes stack along sublanes: f32 -> 8, bf16 -> 16, int8/fp8 -> 32.
    return max(8, 32 // itemsize)


def ele_sum(x0: jax.Array, x1: jax.Array, *,
            min_pallas_bytes: int = _MIN_PALLAS_BYTES) -> jax.Array:
    """Pallas equivalent of EleSumLayer.forward(x) with x = (x0, x1)."""
    assert x0.shape == x1.shape and x0.dtype == x1.dtype

    orig_shape = x0.shape
    n = math.prod(orig_shape) if orig_shape else 1
    itemsize = jnp.dtype(x0.dtype).itemsize
    nbytes = n * itemsize

    # ---- small-tensor fallback (launch overhead dominates) -------------------
    if nbytes < min_pallas_bytes:
        return x0 + x1

    # ---- lane-dense 2D view: (rows, 128) -------------------------------------
    rows = pl.cdiv(n, _LANES)
    pad = rows * _LANES - n  # < 128 elements; zero in the common NCHW case

    def to_2d(x):
        xf = x.reshape(-1)               # metadata-only for contiguous inputs
        if pad:
            xf = jnp.pad(xf, (0, pad))   # only the < 128-element tail
        return xf.reshape(rows, _LANES)

    a2d = to_2d(x0)
    b2d = to_2d(x1)

    # ---- byte-budgeted, dtype-aware tile height -------------------------------
    sub = _sublane_multiple(itemsize)
    tile_r = _TILE_BYTES_PER_OPERAND // (_LANES * itemsize)
    tile_r = max(sub, (tile_r // sub) * sub)          # multiple of sublane pack
    tile_r = min(tile_r, _round_up(rows, sub))        # don't over-allocate VMEM

    # ---- tiled, pipelined pallas_call (ragged last block is boundary-masked) --
    grid = (pl.cdiv(rows, tile_r),)
    block = pl.BlockSpec((tile_r, _LANES), lambda i: (i, 0))

    out2d = pl.pallas_call(
        _elesum_kernel,
        out_shape=jax.ShapeDtypeStruct((rows, _LANES), x0.dtype),
        grid=grid,
        in_specs=[block, block],
        out_specs=block,
        compiler_params=pltpu.CompilerParams(
            dimension_semantics=("parallel",),  # shards across v7x's 2 TCs
        ),
    )(a2d, b2d)

    # ---- back to the original layout ------------------------------------------
    out = out2d.reshape(-1)
    if pad:
        out = out[:n]
    return out.reshape(orig_shape)


if __name__ == "__main__":
    key = jax.random.PRNGKey(0)
    k0, k1, k2, k3 = jax.random.split(key, 4)

    # 1) Module-sized NCHW input (batch=2, channels=4, 16x16) — default path
    #    (small-tensor fallback), semantics identical to x[0] + x[1].
    x0 = jax.random.normal(k0, (2, 4, 16, 16), dtype=jnp.float32)
    x1 = jax.random.normal(k1, (2, 4, 16, 16), dtype=jnp.float32)
    out = ele_sum(x0, x1)
    jax.block_until_ready(out)
    ref = x0 + x1
    assert out.shape == ref.shape and out.dtype == ref.dtype
    assert jnp.allclose(out, ref, atol=1e-6, rtol=1e-6)

    # 2) Same shape, forcing the Pallas path (exercises the kernel itself;
    #    n % 128 == 0, so no pad / no trailing slice).
    out_p = ele_sum(x0, x1, min_pallas_bytes=0)
    jax.block_until_ready(out_p)
    assert jnp.allclose(out_p, ref, atol=1e-6, rtol=1e-6)

    # 3) Non-multiple-of-128 element count, forced Pallas path (exercises the
    #    tail-pad + boundary-masked final block).
    y0 = jax.random.normal(k2, (2, 3, 15, 15), dtype=jnp.float32)
    y1 = jax.random.normal(k3, (2, 3, 15, 15), dtype=jnp.float32)
    out_y = ele_sum(y0, y1, min_pallas_bytes=0)
    jax.block_until_ready(out_y)
    assert jnp.allclose(out_y, y0 + y1, atol=1e-6, rtol=1e-6)

    # 4) bf16 input, forced Pallas path (exercises dtype-aware sublane rounding).
    z0 = x0.astype(jnp.bfloat16)
    z1 = x1.astype(jnp.bfloat16)
    out_z = ele_sum(z0, z1, min_pallas_bytes=0)
    jax.block_until_ready(out_z)
    assert out_z.dtype == jnp.bfloat16
    assert jnp.allclose(out_z.astype(jnp.float32), (z0 + z1).astype(jnp.float32))

    print("KERNEL_OK")
</pallas_src>

<mosaic_0001>
module attributes {stable_mosaic.version = 11 : i64} {
  func.func @_elesum_kernel(%arg0: i32, %arg1: memref<16x128xf32, #tpu.memory_space<vmem>>, %arg2: memref<16x128xf32, #tpu.memory_space<vmem>>, %arg3: memref<16x128xf32, #tpu.memory_space<vmem>>) attributes {dimension_semantics = [#tpu.dimension_semantics<parallel>], iteration_bounds = array<i64: 1>, scalar_prefetch = 0 : i64, scratch_operands = 0 : i64, tpu.core_type = #tpu.core_type<tc>, window_params = [{transform_indices = @transform_0, window_bounds = array<i64: 16, 128>}, {transform_indices = @transform_1, window_bounds = array<i64: 16, 128>}, {transform_indices = @transform_2, window_bounds = array<i64: 16, 128>}]} {
    %c0 = arith.constant 0 : index
    %c0_0 = arith.constant 0 : index
    %0 = vector.load %arg1[%c0, %c0_0] : memref<16x128xf32, #tpu.memory_space<vmem>>, vector<16x128xf32>
    %c0_1 = arith.constant 0 : index
    %c0_2 = arith.constant 0 : index
    %1 = vector.load %arg2[%c0_1, %c0_2] : memref<16x128xf32, #tpu.memory_space<vmem>>, vector<16x128xf32>
    %2 = arith.addf %0, %1 : vector<16x128xf32>
    %c0_3 = arith.constant 0 : index
    %c0_4 = arith.constant 0 : index
    %3 = vector.load %arg3[%c0_3, %c0_4] : memref<16x128xf32, #tpu.memory_space<vmem>>, vector<16x128xf32>
    tpu.vector_store %arg3[%c0_3, %c0_4], %2 {strides = array<i32>} : memref<16x128xf32, #tpu.memory_space<vmem>>, vector<16x128xf32>,
    return
  }
  func.func @transform_0(%arg0: i32) -> (i32, i32) {
    %c0_i32 = arith.constant 0 : i32
    %c0_i32_0 = arith.constant 0 : i32
    return %arg0, %c0_i32 : i32, i32
  }
  func.func @transform_1(%arg0: i32) -> (i32, i32) {
    %c0_i32 = arith.constant 0 : i32
    %c0_i32_0 = arith.constant 0 : i32
    return %arg0, %c0_i32 : i32, i32
  }
  func.func @transform_2(%arg0: i32) -> (i32, i32) {
    %c0_i32 = arith.constant 0 : i32
    %c0_i32_0 = arith.constant 0 : i32
    return %arg0, %c0_i32 : i32, i32
  }
}

</mosaic_0001>

<bundles_post_ra>
// kernel: tpu_custom_call.1
= control target key start
LH: loop header
LB: loop body
LE: loop exit
PB: predicated region body
PF: predicated region fallthrough
CT: control target
= control target key end

     0   :  { %7 = vsyncpa [#allocation3], 0  ;;  %s208_s0 = inlined_call_operand.hbm [shape: f32[16,128], index: 0, kind: input, shape index: {}]   ;;  %s209_s1 = inlined_call_operand.hbm [shape: f32[16,128], index: 1, kind: input, shape index: {}]   ;;  %s210_s2 = inlined_call_operand.hbm [shape: f32[16,128], index: 2, kind: output, shape index: {}]  }
   0x1   :  { %8 = vsyncpa [#allocation6], 0 }
   0x2   :  { %9 = vsyncpa [#allocation4], 0  ;;  %s143_s9 = smov [#allocation2]   ;;  %s71_s13 = scalar_lea.hbm %s208_s0, 256 }
   0x3   :  { %s15_s10 = sshll.u32 %s143_s9, 4  ;;  %p72_p0 = scmp.ne.s32.totalorder %s208_s0, %s71_s13  ;;  %s16_s10 = int_to_ptr.vmem [resolvable:$true] %s15_s10 }
   0x4   :  { %p75_p1 = scmp.lt.u32.totalorder %s71_s13, %s208_s0 }
   0x6   :  { %p77_p2 = pnand %p75_p1, %p72_p0 }
   0x8   :  { %80 = shalt.err (!%p77_p2)
}
   0x9   :  { %s81_s18 = scalar_lea.vmem %s16_s10, 256  ;;  %p86_p4 = scmp.lt.s32.totalorder %s16_s10, %s16_s10 }
   0xa   :  { %p82_p3 = scmp.ne.s32.totalorder %s16_s10, %s81_s18  ;;  %p87_p5 = scmp.lt.s32.totalorder %s81_s18, %s81_s18 }
   0xc   :  { %p88_p6 = por %p87_p5, %p86_p4 }
   0xe   :  { %p89_p7 = pnand %p88_p6, %p82_p3 }
  0x10   :  { %92 = shalt.err (!%p89_p7)
}
  0x11   :  { %s144_s19 = smov 128   ;;  %s145_s20 = smov 8  }
  0x12   :  { %21 = dma.hbm_to_vmem [thread:$0]  %s208_s0, 256, %s16_s10, [#allocation3], %s144_s19, %s144_s19, %s145_s20  }
  0x13   :  { %s146_s23 = smov [#allocation5]   ;;  %s93_s27 = scalar_lea.hbm %s209_s1, 256 }
  0x14   :  { %s27_s24 = sshll.u32 %s146_s23, 4  ;;  %p94_p8 = scmp.ne.s32.totalorder %s209_s1, %s93_s27  ;;  %s28_s24 = int_to_ptr.vmem [resolvable:$true] %s27_s24 }
  0x15   :  { %p97_p9 = scmp.lt.u32.totalorder %s93_s27, %s209_s1 }
  0x17   :  { %p99_p10 = pnand %p97_p9, %p94_p8 }
  0x19   :  { %102 = shalt.err (!%p99_p10)
}
  0x1a   :  { %s103_s4 = scalar_lea.vmem %s28_s24, 256  ;;  %p108_p12 = scmp.lt.s32.totalorder %s28_s24, %s28_s24 }
  0x1b   :  { %p104_p11 = scmp.ne.s32.totalorder %s28_s24, %s103_s4  ;;  %p109_p13 = scmp.lt.s32.totalorder %s103_s4, %s103_s4 }
  0x1d   :  { %p110_p0 = por %p109_p13, %p108_p12 }
  0x1f   :  { %p111_p1 = pnand %p110_p0, %p104_p11 }
  0x21   :  { %114 = shalt.err (!%p111_p1)
}
  0x22   :  { %33 = dma.hbm_to_vmem [thread:$0]  %s209_s1, 256, %s28_s24, [#allocation6], %s144_s19, %s144_s19, %s145_s20  }
  0x23   :  { %137 = dma.done.wait [#allocation3], 256  }
  0x24   :  { %138 = vsyncadd [#allocation3], 4294967040 }
  0x25   :  { %139 = dma.done.wait [#allocation6], 256  }
  0x26   :  { %140 = vsyncadd [#allocation6], 4294967040  ;;  %s147_s6 = smov [#allocation7]   ;;  %v40_v0 = vld [vmem:[#allocation2] sm:$0xff]  ;;  %v42_v1 = vld [vmem:[#allocation5] sm:$0xff] }
  0x27   :  { %s53_s7 = sshll.u32 %s147_s6, 4  ;;  %v41_v2 = vld [vmem:[#allocation2 + $0x8] sm:$0xff]  ;;  %v44_v3 = vadd.f32 %v42_v1, %v40_v0  ;;  %v43_v4 = vld [vmem:[#allocation5 + $0x8] sm:$0xff]  ;;  %s54_s7 = int_to_ptr.vmem [resolvable:$true] %s53_s7 }
  0x28   :  { %v45_v5 = vadd.f32 %v43_v4, %v41_v2  ;;  %s115_s8 = scalar_lea.vmem %s54_s7, 256  ;;  %p120_p3 = scmp.lt.s32.totalorder %s54_s7, %s54_s7 }
  0x29   :  { %46 = vst [vmem:[#allocation7] sm:$0xff] %v44_v3  ;;  %p116_p2 = scmp.ne.s32.totalorder %s54_s7, %s115_s8  ;;  %p121_p4 = scmp.lt.s32.totalorder %s115_s8, %s115_s8 }
  0x2a   :  { %47 = vst [vmem:[#allocation7 + $0x8] sm:$0xff] %v45_v5 }
  0x2b   :  { %p122_p5 = por %p121_p4, %p120_p3 }
  0x2d   :  { %p123_p6 = pnand %p122_p5, %p116_p2 }
  0x2f   :  { %126 = shalt.err (!%p123_p6)
}
  0x30   :  { %s127_s10 = scalar_lea.hbm %s210_s2, 256 }
  0x31   :  { %p128_p7 = scmp.ne.s32.totalorder %s210_s2, %s127_s10  ;;  %p131_p8 = scmp.lt.u32.totalorder %s127_s10, %s210_s2 }
  0x33   :  { %p133_p9 = pnand %p131_p8, %p128_p7 }
  0x35   :  { %136 = shalt.err (!%p133_p9)
}
  0x36   :  { %59 = dma.vmem_to_hbm [thread:$0]  %s54_s7, 256, %s210_s2, [#allocation4], %s144_s19, %s144_s19, %s145_s20  }
  0x37   :  { %141 = dma.done.wait [#allocation4], 256  }
  0x38   :  { %142 = vsyncadd [#allocation4], 4294967040 }
  0x39   :  { %63 = vsyncpa [#allocation3], 1 }
  0x3a   :  { %64 = vsyncpa [#allocation6], 1 }
  0x3b   :  { %65 = vsyncpa [#allocation4], 1 }

</bundles_post_ra>
